<compile_context>
chip_gen: v7x
topology: tpu7x:2x2x1
jax: 0.10.0
libtpu: 0.0.40
codegen_flags: <defaults>
</compile_context>

<pallas_src>
import functools

import jax
import jax.numpy as jnp
from jax.experimental import pallas as pl
from jax.experimental.pallas import tpu as pltpu

_BN_EPS = 1e-5
# Below this min(Cin, Cout) the MXU would be a few % utilised (worst on v5e's
# 128-wide array, even worse relatively on v6e/v7x's 256-wide) -- use VPU FMAs.
_MIN_MXU_DIM = 16


def _dsconv_kernel(x_ref, wd_ref, dwb_ref, wp_ref, pwb_ref, o_ref,
                   *, H, W, HW, n_imgs, cin, cout):
    """Whole batch, lane-dense layout.

    x_ref  : (N*Cin, HW)  batch+channels on sublanes, flattened spatial on lanes
    wd_ref : (N*Cin, 9)   depthwise 3x3 taps (col = kh*3+kw), BN scale folded,
                          tiled over the batch so rows line up with x
    dwb_ref: (N*Cin, 1)   folded depthwise bias (conv bias + BN shift)
    wp_ref : (Cout, Cin)  pointwise weights, BN scale folded in
    pwb_ref: (Cout, 1)    folded pointwise bias
    o_ref  : (N*Cout, HW)
    """
    x = x_ref[...].astype(jnp.float32)                     # (N*Cin, HW)

    # ---- edge-validity masks, generated in-kernel (no HBM mask traffic) ----
    idx = jax.lax.broadcasted_iota(jnp.int32, (1, HW), 1)  # flat spatial index
    col = (idx & (W - 1)) if (W & (W - 1)) == 0 else (idx % W)
    rmask_top = (idx >= W).astype(jnp.float32)             # source row h-1 valid
    rmask_bot = (idx < (H - 1) * W).astype(jnp.float32)    # source row h+1 valid
    cmask_l = (col >= 1).astype(jnp.float32)               # source col w-1 valid
    cmask_r = (col <= W - 2).astype(jnp.float32)           # source col w+1 valid

    # ---- depthwise 3x3, row-band factoring ----
    # x_band[kh][i] = x at (source row h+kh-1, same col w); zero where that row
    # is in the zero-padding halo.  Rolls are XLU lane rotates (off the VALU
    # critical slot); circular-wrap positions are killed by the masks.
    x_band = (
        pltpu.roll(x, shift=W % HW, axis=1) * rmask_top,         # kh = 0
        x,                                                        # kh = 1
        pltpu.roll(x, shift=(HW - W) % HW, axis=1) * rmask_bot,   # kh = 2
    )
    wd = wd_ref[...]                                        # (N*Cin, 9)

    def col_sum(kw):
        s_col = (-(kw - 1)) % HW
        terms = []
        for kh in range(3):
            b = x_band[kh] if s_col == 0 else pltpu.roll(x_band[kh], shift=s_col, axis=1)
            k = kh * 3 + kw
            terms.append(b * wd[:, k:k + 1])
        return terms[0] + terms[1] + terms[2]

    acc = col_sum(1)                                        # centre column
    acc = acc + cmask_l * col_sum(0)                        # left column
    acc = acc + cmask_r * col_sum(2)                        # right column

    # folded depthwise BN bias + ReLU
    z = jnp.maximum(acc + dwb_ref[...], 0.0)                # (N*Cin, HW), f32

    # ---- pointwise 1x1 conv == (Cout, Cin) @ (Cin, HW), per image ----
    wp = wp_ref[...].astype(jnp.float32)
    pwb = pwb_ref[...]
    use_mxu = min(cin, cout) >= _MIN_MXU_DIM
    for n in range(n_imgs):
        zb = z[n * cin:(n + 1) * cin, :]                    # (Cin, HW)
        if use_mxu:
            if x_ref.dtype == jnp.bfloat16:
                # bf16 MXU feeds (v6e/v7x native), f32 accumulation.
                yb = jnp.dot(wp.astype(jnp.bfloat16), zb.astype(jnp.bfloat16),
                             preferred_element_type=jnp.float32)
            else:
                yb = jnp.dot(wp, zb, preferred_element_type=jnp.float32)
        else:
            # tiny contraction/output dims: a handful of VPU FMAs beats a
            # near-empty MXU push.
            yb = wp[:, 0:1] * zb[0:1, :]
            for c in range(1, cin):
                yb = yb + wp[:, c:c + 1] * zb[c:c + 1, :]
        yb = jnp.maximum(yb + pwb, 0.0)                     # (Cout, HW)
        o_ref[n * cout:(n + 1) * cout, :] = yb.astype(o_ref.dtype)


def depthwise_separable_conv(x_nchw, params):
    (wd, bd, g1, b1, m1, v1, wp, bp, g2, b2, m2, v2) = params
    N, Cin, H, W = x_nchw.shape
    Cout = wp.shape[0]
    HW = H * W

    # ---- fold eval-mode BatchNorm scales into the conv weights ----
    s1 = g1 / jnp.sqrt(v1 + _BN_EPS)                                 # (Cin,)
    wd_k = wd.reshape(Cin, 9).astype(jnp.float32) * s1[:, None]      # (Cin, 9)
    dw_bias = ((bd - m1) * s1 + b1).reshape(Cin, 1).astype(jnp.float32)

    s2 = g2 / jnp.sqrt(v2 + _BN_EPS)                                 # (Cout,)
    wp_k = wp.reshape(Cout, Cin).astype(jnp.float32) * s2[:, None]   # (Cout, Cin)
    pw_bias = ((bp - m2) * s2 + b2).reshape(Cout, 1).astype(jnp.float32)

    # tile depthwise params across the batch so rows match the (N*Cin, HW) slab
    wd_t = jnp.tile(wd_k, (N, 1))                                    # (N*Cin, 9)
    dwb_t = jnp.tile(dw_bias, (N, 1))                                # (N*Cin, 1)

    # NCHW with (N, C) merged onto sublanes and (H, W) merged onto lanes:
    # free contiguous reshape, read from HBM exactly once.
    x_flat = x_nchw.reshape(N * Cin, HW)

    kernel = functools.partial(_dsconv_kernel, H=H, W=W, HW=HW,
                               n_imgs=N, cin=Cin, cout=Cout)

    vmem = pltpu.MemorySpace.VMEM
    out_flat = pl.pallas_call(
        kernel,
        out_shape=jax.ShapeDtypeStruct((N * Cout, HW), x_nchw.dtype),
        in_specs=[pl.BlockSpec(memory_space=vmem)] * 5,   # whole arrays in VMEM
        out_specs=pl.BlockSpec(memory_space=vmem),
    )(x_flat, wd_t, dwb_t, wp_k, pw_bias)

    return out_flat.reshape(N, Cout, H, W)      # already NCHW -- free reshape


def _ref_forward(x, params):
    """Plain-JAX reference (NCHW), eval-mode BatchNorm."""
    (wd, bd, g1, b1, m1, v1, wp, bp, g2, b2, m2, v2) = params
    Cin = x.shape[1]

    def bn(y, g, b, m, v):
        c = (None, slice(None), None, None)
        return (y - m[c]) / jnp.sqrt(v + _BN_EPS)[c] * g[c] + b[c]

    y = jax.lax.conv_general_dilated(
        x, wd, (1, 1), "SAME", feature_group_count=Cin,
        dimension_numbers=("NCHW", "OIHW", "NCHW"))
    y = y + bd[None, :, None, None]
    y = jnp.maximum(bn(y, g1, b1, m1, v1), 0.0)
    y = jax.lax.conv_general_dilated(
        y, wp, (1, 1), "VALID", dimension_numbers=("NCHW", "OIHW", "NCHW"))
    y = y + bp[None, :, None, None]
    return jnp.maximum(bn(y, g2, b2, m2, v2), 0.0)


if __name__ == "__main__":
    N, Cin, Cout, H, W = 2, 4, 8, 16, 16
    ks = jax.random.split(jax.random.PRNGKey(0), 13)

    x = jax.random.normal(ks[0], (N, Cin, H, W), jnp.float32)

    # deterministic synthetic parameters (shapes per the module __init__)
    wd = jax.random.normal(ks[1], (Cin, 1, 3, 3), jnp.float32) * 0.2     # depthwise
    bd = jax.random.normal(ks[2], (Cin,), jnp.float32) * 0.1
    g1 = jax.random.uniform(ks[3], (Cin,), jnp.float32, 0.5, 1.5)        # BN depthwise
    b1 = jax.random.normal(ks[4], (Cin,), jnp.float32) * 0.1
    m1 = jax.random.normal(ks[5], (Cin,), jnp.float32) * 0.1
    v1 = jax.random.uniform(ks[6], (Cin,), jnp.float32, 0.5, 1.5)
    wp = jax.random.normal(ks[7], (Cout, Cin, 1, 1), jnp.float32) * 0.2  # pointwise
    bp = jax.random.normal(ks[8], (Cout,), jnp.float32) * 0.1
    g2 = jax.random.uniform(ks[9], (Cout,), jnp.float32, 0.5, 1.5)       # BN pointwise
    b2 = jax.random.normal(ks[10], (Cout,), jnp.float32) * 0.1
    m2 = jax.random.normal(ks[11], (Cout,), jnp.float32) * 0.1
    v2 = jax.random.uniform(ks[12], (Cout,), jnp.float32, 0.5, 1.5)

    params = (wd, bd, g1, b1, m1, v1, wp, bp, g2, b2, m2, v2)

    out = depthwise_separable_conv(x, params)
    out = jax.block_until_ready(out)

    ref = _ref_forward(x, params)
    assert out.shape == (N, Cout, H, W), out.shape
    max_err = float(jnp.max(jnp.abs(out - ref)))
    assert max_err < 1e-4, f"mismatch vs reference: {max_err}"

    print("KERNEL_OK")
</pallas_src>

<mosaic_0001>
module attributes {stable_mosaic.version = 11 : i64} {
  func.func @_dsconv_kernel(%arg0: memref<8x256xf32, #tpu.memory_space<vmem>>, %arg1: memref<8x9xf32, #tpu.memory_space<vmem>>, %arg2: memref<8x1xf32, #tpu.memory_space<vmem>>, %arg3: memref<8x4xf32, #tpu.memory_space<vmem>>, %arg4: memref<8x1xf32, #tpu.memory_space<vmem>>, %arg5: memref<16x256xf32, #tpu.memory_space<vmem>>) attributes {dimension_semantics = [], scalar_prefetch = 0 : i64, scratch_operands = 0 : i64, tpu.core_type = #tpu.core_type<tc>} {
    %c0 = arith.constant 0 : index
    %c0_0 = arith.constant 0 : index
    %0 = vector.load %arg0[%c0, %c0_0] : memref<8x256xf32, #tpu.memory_space<vmem>>, vector<8x256xf32>
    %1 = tpu.iota {dimensions = array<i32: 1>} : vector<1x256xi32>
    %c15_i32 = arith.constant 15 : i32
    %2 = vector.broadcast %c15_i32 : i32 to vector<1x256xi32>
    %3 = arith.andi %1, %2 : vector<1x256xi32>
    %c16_i32 = arith.constant 16 : i32
    %4 = vector.broadcast %c16_i32 : i32 to vector<1x256xi32>
    %5 = arith.cmpi sge, %1, %4 : vector<1x256xi32>
    %6 = arith.extui %5 : vector<1x256xi1> to vector<1x256xi32>
    %7 = arith.sitofp %6 : vector<1x256xi32> to vector<1x256xf32>
    %c240_i32 = arith.constant 240 : i32
    %8 = vector.broadcast %c240_i32 : i32 to vector<1x256xi32>
    %9 = arith.cmpi slt, %1, %8 : vector<1x256xi32>
    %10 = arith.extui %9 : vector<1x256xi1> to vector<1x256xi32>
    %11 = arith.sitofp %10 : vector<1x256xi32> to vector<1x256xf32>
    %c1_i32 = arith.constant 1 : i32
    %12 = vector.broadcast %c1_i32 : i32 to vector<1x256xi32>
    %13 = arith.cmpi sge, %3, %12 : vector<1x256xi32>
    %14 = arith.extui %13 : vector<1x256xi1> to vector<1x256xi32>
    %15 = arith.sitofp %14 : vector<1x256xi32> to vector<1x256xf32>
    %c14_i32 = arith.constant 14 : i32
    %16 = vector.broadcast %c14_i32 : i32 to vector<1x256xi32>
    %17 = arith.cmpi sle, %3, %16 : vector<1x256xi32>
    %18 = arith.extui %17 : vector<1x256xi1> to vector<1x256xi32>
    %19 = arith.sitofp %18 : vector<1x256xi32> to vector<1x256xf32>
    %c16_i32_1 = arith.constant 16 : i32
    %20 = tpu.dynamic_rotate %0 by %c16_i32_1 dim 1 : vector<8x256xf32>, i32 -> vector<8x256xf32>
    %21 = vector.broadcast %7 : vector<1x256xf32> to vector<8x256xf32>
    %22 = arith.mulf %20, %21 : vector<8x256xf32>
    %c240_i32_2 = arith.constant 240 : i32
    %23 = tpu.dynamic_rotate %0 by %c240_i32_2 dim 1 : vector<8x256xf32>, i32 -> vector<8x256xf32>
    %24 = vector.broadcast %11 : vector<1x256xf32> to vector<8x256xf32>
    %25 = arith.mulf %23, %24 : vector<8x256xf32>
    %c0_3 = arith.constant 0 : index
    %c0_4 = arith.constant 0 : index
    %26 = vector.load %arg1[%c0_3, %c0_4] : memref<8x9xf32, #tpu.memory_space<vmem>>, vector<8x9xf32>
    %27 = vector.extract_strided_slice %26 {offsets = [0, 1], sizes = [8, 1], strides = [1, 1]} : vector<8x9xf32> to vector<8x1xf32>
    %28 = vector.broadcast %27 : vector<8x1xf32> to vector<8x256xf32>
    %29 = arith.mulf %22, %28 : vector<8x256xf32>
    %30 = vector.extract_strided_slice %26 {offsets = [0, 4], sizes = [8, 1], strides = [1, 1]} : vector<8x9xf32> to vector<8x1xf32>
    %31 = vector.broadcast %30 : vector<8x1xf32> to vector<8x256xf32>
    %32 = arith.mulf %0, %31 : vector<8x256xf32>
    %33 = vector.extract_strided_slice %26 {offsets = [0, 7], sizes = [8, 1], strides = [1, 1]} : vector<8x9xf32> to vector<8x1xf32>
    %34 = vector.broadcast %33 : vector<8x1xf32> to vector<8x256xf32>
    %35 = arith.mulf %25, %34 : vector<8x256xf32>
    %36 = arith.addf %29, %32 : vector<8x256xf32>
    %37 = arith.addf %36, %35 : vector<8x256xf32>
    %c1_i32_5 = arith.constant 1 : i32
    %38 = tpu.dynamic_rotate %22 by %c1_i32_5 dim 1 : vector<8x256xf32>, i32 -> vector<8x256xf32>
    %39 = vector.extract_strided_slice %26 {offsets = [0, 0], sizes = [8, 1], strides = [1, 1]} : vector<8x9xf32> to vector<8x1xf32>
    %40 = vector.broadcast %39 : vector<8x1xf32> to vector<8x256xf32>
    %41 = arith.mulf %38, %40 : vector<8x256xf32>
    %c1_i32_6 = arith.constant 1 : i32
    %42 = tpu.dynamic_rotate %0 by %c1_i32_6 dim 1 : vector<8x256xf32>, i32 -> vector<8x256xf32>
    %43 = vector.extract_strided_slice %26 {offsets = [0, 3], sizes = [8, 1], strides = [1, 1]} : vector<8x9xf32> to vector<8x1xf32>
    %44 = vector.broadcast %43 : vector<8x1xf32> to vector<8x256xf32>
    %45 = arith.mulf %42, %44 : vector<8x256xf32>
    %c1_i32_7 = arith.constant 1 : i32
    %46 = tpu.dynamic_rotate %25 by %c1_i32_7 dim 1 : vector<8x256xf32>, i32 -> vector<8x256xf32>
    %47 = vector.extract_strided_slice %26 {offsets = [0, 6], sizes = [8, 1], strides = [1, 1]} : vector<8x9xf32> to vector<8x1xf32>
    %48 = vector.broadcast %47 : vector<8x1xf32> to vector<8x256xf32>
    %49 = arith.mulf %46, %48 : vector<8x256xf32>
    %50 = arith.addf %41, %45 : vector<8x256xf32>
    %51 = arith.addf %50, %49 : vector<8x256xf32>
    %52 = vector.broadcast %15 : vector<1x256xf32> to vector<8x256xf32>
    %53 = arith.mulf %52, %51 : vector<8x256xf32>
    %54 = arith.addf %37, %53 : vector<8x256xf32>
    %c255_i32 = arith.constant 255 : i32
    %55 = tpu.dynamic_rotate %22 by %c255_i32 dim 1 : vector<8x256xf32>, i32 -> vector<8x256xf32>
    %56 = vector.extract_strided_slice %26 {offsets = [0, 2], sizes = [8, 1], strides = [1, 1]} : vector<8x9xf32> to vector<8x1xf32>
    %57 = vector.broadcast %56 : vector<8x1xf32> to vector<8x256xf32>
    %58 = arith.mulf %55, %57 : vector<8x256xf32>
    %c255_i32_8 = arith.constant 255 : i32
    %59 = tpu.dynamic_rotate %0 by %c255_i32_8 dim 1 : vector<8x256xf32>, i32 -> vector<8x256xf32>
    %60 = vector.extract_strided_slice %26 {offsets = [0, 5], sizes = [8, 1], strides = [1, 1]} : vector<8x9xf32> to vector<8x1xf32>
    %61 = vector.broadcast %60 : vector<8x1xf32> to vector<8x256xf32>
    %62 = arith.mulf %59, %61 : vector<8x256xf32>
    %c255_i32_9 = arith.constant 255 : i32
    %63 = tpu.dynamic_rotate %25 by %c255_i32_9 dim 1 : vector<8x256xf32>, i32 -> vector<8x256xf32>
    %64 = vector.extract_strided_slice %26 {offsets = [0, 8], sizes = [8, 1], strides = [1, 1]} : vector<8x9xf32> to vector<8x1xf32>
    %65 = vector.broadcast %64 : vector<8x1xf32> to vector<8x256xf32>
    %66 = arith.mulf %63, %65 : vector<8x256xf32>
    %67 = arith.addf %58, %62 : vector<8x256xf32>
    %68 = arith.addf %67, %66 : vector<8x256xf32>
    %69 = vector.broadcast %19 : vector<1x256xf32> to vector<8x256xf32>
    %70 = arith.mulf %69, %68 : vector<8x256xf32>
    %71 = arith.addf %54, %70 : vector<8x256xf32>
    %c0_10 = arith.constant 0 : index
    %c0_11 = arith.constant 0 : index
    %72 = vector.load %arg2[%c0_10, %c0_11] : memref<8x1xf32, #tpu.memory_space<vmem>>, vector<8x1xf32>
    %73 = vector.broadcast %72 : vector<8x1xf32> to vector<8x256xf32>
    %74 = arith.addf %71, %73 : vector<8x256xf32>
    %cst = arith.constant 0.000000e+00 : f32
    %75 = vector.broadcast %cst : f32 to vector<8x256xf32>
    %76 = arith.maximumf %74, %75 : vector<8x256xf32>
    %c0_12 = arith.constant 0 : index
    %c0_13 = arith.constant 0 : index
    %77 = vector.load %arg3[%c0_12, %c0_13] : memref<8x4xf32, #tpu.memory_space<vmem>>, vector<8x4xf32>
    %c0_14 = arith.constant 0 : index
    %c0_15 = arith.constant 0 : index
    %78 = vector.load %arg4[%c0_14, %c0_15] : memref<8x1xf32, #tpu.memory_space<vmem>>, vector<8x1xf32>
    %79 = vector.extract_strided_slice %76 {offsets = [0, 0], sizes = [4, 256], strides = [1, 1]} : vector<8x256xf32> to vector<4x256xf32>
    %80 = vector.extract_strided_slice %77 {offsets = [0, 0], sizes = [8, 1], strides = [1, 1]} : vector<8x4xf32> to vector<8x1xf32>
    %81 = vector.extract_strided_slice %79 {offsets = [0, 0], sizes = [1, 256], strides = [1, 1]} : vector<4x256xf32> to vector<1x256xf32>
    %82 = vector.broadcast %80 : vector<8x1xf32> to vector<8x256xf32>
    %83 = vector.broadcast %81 : vector<1x256xf32> to vector<8x256xf32>
    %84 = arith.mulf %82, %83 : vector<8x256xf32>
    %85 = vector.extract_strided_slice %77 {offsets = [0, 1], sizes = [8, 1], strides = [1, 1]} : vector<8x4xf32> to vector<8x1xf32>
    %86 = vector.extract_strided_slice %79 {offsets = [1, 0], sizes = [1, 256], strides = [1, 1]} : vector<4x256xf32> to vector<1x256xf32>
    %87 = vector.broadcast %85 : vector<8x1xf32> to vector<8x256xf32>
    %88 = vector.broadcast %86 : vector<1x256xf32> to vector<8x256xf32>
    %89 = arith.mulf %87, %88 : vector<8x256xf32>
    %90 = arith.addf %84, %89 : vector<8x256xf32>
    %91 = vector.extract_strided_slice %77 {offsets = [0, 2], sizes = [8, 1], strides = [1, 1]} : vector<8x4xf32> to vector<8x1xf32>
    %92 = vector.extract_strided_slice %79 {offsets = [2, 0], sizes = [1, 256], strides = [1, 1]} : vector<4x256xf32> to vector<1x256xf32>
    %93 = vector.broadcast %91 : vector<8x1xf32> to vector<8x256xf32>
    %94 = vector.broadcast %92 : vector<1x256xf32> to vector<8x256xf32>
    %95 = arith.mulf %93, %94 : vector<8x256xf32>
    %96 = arith.addf %90, %95 : vector<8x256xf32>
    %97 = vector.extract_strided_slice %77 {offsets = [0, 3], sizes = [8, 1], strides = [1, 1]} : vector<8x4xf32> to vector<8x1xf32>
    %98 = vector.extract_strided_slice %79 {offsets = [3, 0], sizes = [1, 256], strides = [1, 1]} : vector<4x256xf32> to vector<1x256xf32>
    %99 = vector.broadcast %97 : vector<8x1xf32> to vector<8x256xf32>
    %100 = vector.broadcast %98 : vector<1x256xf32> to vector<8x256xf32>
    %101 = arith.mulf %99, %100 : vector<8x256xf32>
    %102 = arith.addf %96, %101 : vector<8x256xf32>
    %103 = vector.broadcast %78 : vector<8x1xf32> to vector<8x256xf32>
    %104 = arith.addf %102, %103 : vector<8x256xf32>
    %cst_16 = arith.constant 0.000000e+00 : f32
    %105 = vector.broadcast %cst_16 : f32 to vector<8x256xf32>
    %106 = arith.maximumf %104, %105 : vector<8x256xf32>
    %c0_17 = arith.constant 0 : index
    %c0_18 = arith.constant 0 : index
    %107 = vector.load %arg5[%c0_17, %c0_18] : memref<16x256xf32, #tpu.memory_space<vmem>>, vector<8x256xf32>
    tpu.vector_store %arg5[%c0_17, %c0_18], %106 {strides = array<i32>} : memref<16x256xf32, #tpu.memory_space<vmem>>, vector<8x256xf32>,
    %108 = vector.extract_strided_slice %76 {offsets = [4, 0], sizes = [4, 256], strides = [1, 1]} : vector<8x256xf32> to vector<4x256xf32>
    %109 = vector.extract_strided_slice %77 {offsets = [0, 0], sizes = [8, 1], strides = [1, 1]} : vector<8x4xf32> to vector<8x1xf32>
    %110 = vector.extract_strided_slice %108 {offsets = [0, 0], sizes = [1, 256], strides = [1, 1]} : vector<4x256xf32> to vector<1x256xf32>
    %111 = vector.broadcast %109 : vector<8x1xf32> to vector<8x256xf32>
    %112 = vector.broadcast %110 : vector<1x256xf32> to vector<8x256xf32>
    %113 = arith.mulf %111, %112 : vector<8x256xf32>
    %114 = vector.extract_strided_slice %77 {offsets = [0, 1], sizes = [8, 1], strides = [1, 1]} : vector<8x4xf32> to vector<8x1xf32>
    %115 = vector.extract_strided_slice %108 {offsets = [1, 0], sizes = [1, 256], strides = [1, 1]} : vector<4x256xf32> to vector<1x256xf32>
    %116 = vector.broadcast %114 : vector<8x1xf32> to vector<8x256xf32>
    %117 = vector.broadcast %115 : vector<1x256xf32> to vector<8x256xf32>
    %118 = arith.mulf %116, %117 : vector<8x256xf32>
    %119 = arith.addf %113, %118 : vector<8x256xf32>
    %120 = vector.extract_strided_slice %77 {offsets = [0, 2], sizes = [8, 1], strides = [1, 1]} : vector<8x4xf32> to vector<8x1xf32>
    %121 = vector.extract_strided_slice %108 {offsets = [2, 0], sizes = [1, 256], strides = [1, 1]} : vector<4x256xf32> to vector<1x256xf32>
    %122 = vector.broadcast %120 : vector<8x1xf32> to vector<8x256xf32>
    %123 = vector.broadcast %121 : vector<1x256xf32> to vector<8x256xf32>
    %124 = arith.mulf %122, %123 : vector<8x256xf32>
    %125 = arith.addf %119, %124 : vector<8x256xf32>
    %126 = vector.extract_strided_slice %77 {offsets = [0, 3], sizes = [8, 1], strides = [1, 1]} : vector<8x4xf32> to vector<8x1xf32>
    %127 = vector.extract_strided_slice %108 {offsets = [3, 0], sizes = [1, 256], strides = [1, 1]} : vector<4x256xf32> to vector<1x256xf32>
    %128 = vector.broadcast %126 : vector<8x1xf32> to vector<8x256xf32>
    %129 = vector.broadcast %127 : vector<1x256xf32> to vector<8x256xf32>
    %130 = arith.mulf %128, %129 : vector<8x256xf32>
    %131 = arith.addf %125, %130 : vector<8x256xf32>
    %132 = vector.broadcast %78 : vector<8x1xf32> to vector<8x256xf32>
    %133 = arith.addf %131, %132 : vector<8x256xf32>
    %cst_19 = arith.constant 0.000000e+00 : f32
    %134 = vector.broadcast %cst_19 : f32 to vector<8x256xf32>
    %135 = arith.maximumf %133, %134 : vector<8x256xf32>
    %c8 = arith.constant 8 : index
    %c0_20 = arith.constant 0 : index
    %136 = vector.load %arg5[%c8, %c0_20] : memref<16x256xf32, #tpu.memory_space<vmem>>, vector<8x256xf32>
    tpu.vector_store %arg5[%c8, %c0_20], %135 {strides = array<i32>} : memref<16x256xf32, #tpu.memory_space<vmem>>, vector<8x256xf32>,
    return
  }
}

</mosaic_0001>

<bundles_post_ra>
// kernel: tpu_custom_call.1
= control target key start
LH: loop header
LB: loop body
LE: loop exit
PB: predicated region body
PF: predicated region fallthrough
CT: control target
= control target key end

     0   :  { %s399_s20 = smov 112   ;;  %s400_s21 = smov 16   ;;  %v401_v2 = vmov 3   ;;  %v402_v3 = vmov 4   ;;  %s568_s0 = inlined_call_operand.vmem [shape: f32[8,256], index: 0, kind: input, shape index: {}]   ;;  %s569_s1 = inlined_call_operand.vmem [shape: f32[8,9], index: 1, kind: input, shape index: {}]   ;;  %s570_s2 = inlined_call_operand.vmem [shape: f32[8,1], index: 2, kind: input, shape index: {}]   ;;  %s571_s3 = inlined_call_operand.vmem [shape: f32[8,4], index: 3, kind: input, shape index: {}]   ;;  %s572_s4 = inlined_call_operand.vmem [shape: f32[8,1], index: 4, kind: input, shape index: {}]   ;;  %s573_s5 = inlined_call_operand.hbm [shape: f32[16,256], index: 5, kind: output, shape index: {}]  }
   0x1   :  { %v448_v0 = vld [vmem:[%s568_s0] sm:$0xff]  ;;  %v456_v1 = vld [vmem:[%s568_s0 + $0x8] sm:$0xff]  ;;  %360 = vset.pattern.permute.xlu1 %v401_v2  ;;  %362 = vset.pattern.permute.xlu0 %v402_v3 }
   0x2   :  { %61 = vrot.lane.b32.xlu1 %v448_v0, %s399_s20  ;;  %52 = vrot.lane.b32.xlu0 %v448_v0, %s400_s21 }
   0x3   :  { %10 = vsyncpa [#allocation3], 0  ;;  %v70_v4 = vld [vmem:[%s569_s1] sm:$0xff]  ;;  %v403_v5 = vmov 1   ;;  %v404_v6 = vmov 5   ;;  %v405_v7 = vmov 6   ;;  %v23_v12 = vlaneseq }
   0x4   :  { %v406_v8 = vmov 0   ;;  %v407_v9 = vmov 2   ;;  %s408_s0 = smov 1   ;;  %s409_s1 = smov 127   ;;  %v410_v10 = vmov 7   ;;  %v411_v11 = vmov 8  }
   0x5   :  { %v476_v13 = vand.u32 127, %v23_v12  ;;  %v412_v21 = vmov 0.0   ;;  %v184_v28 = vld [vmem:[%s570_s2] sm:$0xff] }
   0x6   :  { %63 = vrot.lane.b32.xlu1 %v456_v1, %s399_s20  ;;  %54 = vrot.lane.b32.xlu0 %v456_v1, %s400_s21  ;;  %v194_v29 = vld [vmem:[%s571_s3] sm:$0xff]  ;;  %s413_s3 = smov [#allocation2]  }
   0x7   :  { %v479_v16 = vadd.s32 128, %v476_v13  ;;  %vm65_vm0 = vcmp.lt.s32.totalorder %v476_v13, 112  ;;  %vm56_vm1 = vcmp.lt.s32.totalorder %v476_v13, 16  ;;  %vm28_vm3 = vcmp.ge.s32.totalorder %v476_v13, 16  ;;  %v195_v33 = vld [vmem:[%s572_s4] sm:$0xff]  ;;  %s327_s4 = sshll.u32 %s413_s3, 4  ;;  %s328_s4 = int_to_ptr.vmem [resolvable:$true] %s327_s4 }
   0x8   :  { %v338_v24 = vsel %vm28_vm3, 1.0, %v412_v21  ;;  %vm98_vm4 = vcmp.lt.s32.totalorder %v476_v13, 1  ;;  %vm143_vm5 = vcmp.lt.s32.totalorder %v476_v13, 127  ;;  %s375_s6 = scalar_lea.vmem %s328_s4, 512  ;;  %p380_p1 = scmp.lt.s32.totalorder %s328_s4, %s328_s4 }
   0x9   :  { %vm35_vm2 = vcmp.lt.s32.totalorder %v479_v16, 240  ;;  %v27_v56 = vand.u32 15, %v479_v16  ;;  %p376_p0 = scmp.ne.s32.totalorder %s328_s4, %s375_s6  ;;  %p381_p2 = scmp.lt.s32.totalorder %s375_s6, %s375_s6 }
   0xa   :  { %114 = vperm.xlu1 %360, %v70_v4   ;;  %79 = vperm.xlu0 %362, %v70_v4   ;;  %v339_v22 = vsel %vm35_vm2, 1.0, %v412_v21 }
   0xb   :  { %vm41_vm6 = vcmp.ge.s32.totalorder %v27_v56, 1  ;;  %vm539_vm7 = vcmp.le.s32.totalorder %v27_v56, 14  ;;  %p382_p3 = por %p381_p2, %p380_p1 }
   0xd   :  { %p383_p4 = pnand %p382_p3, %p376_p0 }
   0xe   :  { %361 = vset.pattern.permute.xlu1 %v403_v5  ;;  %365 = vset.pattern.permute.xlu0 %v404_v6  ;;  %v26_v6 = vand.u32 15, %v476_v13 }
   0xf   :  { %73 = vperm.xlu1 %361, %v70_v4   ;;  %159 = vperm.xlu0 %365, %v70_v4  }
  0x10   :  { %vm40_vm8 = vcmp.ge.s32.totalorder %v26_v6, 1  ;;  %vm46_vm9 = vcmp.le.s32.totalorder %v26_v6, 14 }
  0x11   :  { %v340_v13 = vsel %vm40_vm8, 1.0, %v412_v21 }
  0x13   :  { %363 = vset.pattern.permute.xlu1 %v405_v7  ;;  %366 = vset.pattern.permute.xlu0 %v406_v8  ;;  %v341_v7 = vsel %vm41_vm6, 1.0, %v412_v21 }
  0x14   :  { %126 = vperm.xlu1 %363, %v70_v4   ;;  %102 = vperm.xlu0 %366, %v70_v4  }
  0x18   :  { %364 = vset.pattern.permute.xlu1 %v407_v9  ;;  %107 = vrot.lane.b32.xlu0 %v448_v0, %s408_s0 }
  0x19   :  { %147 = vperm.xlu1 %364, %v70_v4  }
  0x1c   :  { %152 = vrot.lane.b32.xlu0 %v448_v0, %s409_s1 }
  0x1d   :  { %367 = vset.pattern.permute.xlu1 %v410_v10 }
  0x1e   :  { %85 = vperm.xlu1 %367, %v70_v4  }
  0x22   :  { %368 = vset.pattern.permute.xlu1 %v411_v11 }
  0x23   :  { %171 = vperm.xlu1 %368, %v70_v4  }
  0x27   :  { %109 = vrot.lane.b32.xlu1 %v456_v1, %s408_s0 }
  0x28   :  { %369 = vset.pattern.permute.xlu1 %v406_v8 }
  0x2b   :  { %154 = vrot.lane.b32.xlu1 %v456_v1, %s409_s1 }
  0x74   :  { %v62_v14 = vpop.permute.xlu1 %61  ;;  %v53_v15 = vpop.permute.xlu0 %52 }
  0x78   :  { %v64_v17 = vpop.permute.xlu1 %63  ;;  %v55_v18 = vpop.permute.xlu0 %54 }
  0x79   :  { %v66_v19 = vsel %vm65_vm0, %v62_v14, %v64_v17  ;;  %v57_v20 = vsel %vm56_vm1, %v53_v15, %v55_v18  ;;  %v67_v23 = vsel %vm65_vm0, %v64_v17, %v62_v14  ;;  %v58_v25 = vsel %vm56_vm1, %v55_v18, %v53_v15 }
  0x7a   :  { %119 = vrot.lane.b32.xlu0 %v66_v19, %s408_s0  ;;  %96 = vrot.lane.b32.xlu1 %v57_v20, %s408_s0  ;;  %v69_v26 = vmul.f32 %v339_v22, %v67_v23  ;;  %v59_v27 = vmul.f32 %v338_v24, %v58_v25 }
  0x7e   :  { %164 = vrot.lane.b32.xlu0 %v66_v19, %s409_s1  ;;  %141 = vrot.lane.b32.xlu1 %v57_v20, %s409_s1 }
  0x82   :  { %94 = vrot.lane.b32.xlu0 %v59_v27, %s408_s0  ;;  %121 = vrot.lane.b32.xlu1 %v69_v26, %s408_s0 }
  0x86   :  { %139 = vrot.lane.b32.xlu0 %v59_v27, %s409_s1  ;;  %166 = vrot.lane.b32.xlu1 %v69_v26, %s409_s1 }
  0x89   :  { %v115_v30 = vpop.permute.xlu1 %114  ;;  %v80_v34 = vpop.permute.xlu0 %79 }
  0x8a   :  { %187 = vperm.xlu0 %366, %v184_v28   ;;  %198 = vperm.xlu1 %369, %v194_v29   ;;  %v82_v38 = vmul.f32 %v80_v34, %v448_v0  ;;  %v83_v39 = vmul.f32 %v80_v34, %v456_v1 }
  0x8e   :  { %370 = vset.pattern.permute.xlu1 %v403_v5  ;;  %371 = vset.pattern.permute.xlu0 %v407_v9  ;;  %v74_v31 = vpop.permute.xlu1 %73  ;;  %v160_v47 = vpop.permute.xlu0 %159 }
  0x8f   :  { %212 = vperm.xlu1 %370, %v194_v29   ;;  %228 = vperm.xlu0 %371, %v194_v29   ;;  %v76_v36 = vmul.f32 %v74_v31, %v59_v27  ;;  %v77_v37 = vmul.f32 %v74_v31, %v57_v20 }
  0x91   :  { %v90_v41 = vadd.f32 %v82_v38, %v76_v36  ;;  %v91_v42 = vadd.f32 %v83_v39, %v77_v37  ;;  %v343_v38 = vsel %vm539_vm7, 1.0, %v412_v21 }
  0x93   :  { %372 = vset.pattern.permute.xlu1 %v401_v2  ;;  %v502_v32 = vpop.permute.xlu1 %126  ;;  %374 = vset.pattern.permute.xlu0 %v406_v8  ;;  %v103_v49 = vpop.permute.xlu0 %102 }
  0x94   :  { %244 = vperm.xlu1 %372, %v194_v29  }
  0x97   :  { %v108_v51 = vpop.permute.xlu0 %107 }
  0x98   :  { %373 = vset.pattern.permute.xlu1 %v406_v8  ;;  %v148_v35 = vpop.permute.xlu1 %147 }
  0x99   :  { %261 = vperm.xlu1 %373, %v195_v33  }
  0x9b   :  { %v153_v53 = vpop.permute.xlu0 %152 }
  0x9d   :  { %v86_v40 = vpop.permute.xlu1 %85 }
  0x9e   :  { %v88_v43 = vmul.f32 %v86_v40, %v66_v19  ;;  %v89_v44 = vmul.f32 %v86_v40, %v69_v26 }
  0xa0   :  { %v511_v45 = vadd.f32 %v90_v41, %v88_v43  ;;  %v93_v46 = vadd.f32 %v91_v42, %v89_v44 }
  0xa2   :  { %v172_v48 = vpop.permute.xlu1 %171 }
  0xa6   :  { %v110_v50 = vpop.permute.xlu1 %109 }
  0xa7   :  { %v111_v59 = vsel %vm98_vm4, %v108_v51, %v110_v50  ;;  %v112_v62 = vsel %vm98_vm4, %v110_v50, %v108_v51 }
  0xa8   :  { %v118_v2 = vmul.f32 %v115_v30, %v111_v59  ;;  %v117_v8 = vmul.f32 %v115_v30, %v112_v62 }
  0xaa   :  { %v155_v52 = vpop.permute.xlu1 %154 }
  0xab   :  { %v156_v5 = vsel %vm143_vm5, %v153_v53, %v155_v52  ;;  %v157_v9 = vsel %vm143_vm5, %v155_v52, %v153_v53 }
  0xac   :  { %v162_v20 = vmul.f32 %v160_v47, %v156_v5  ;;  %v163_v25 = vmul.f32 %v160_v47, %v157_v9  ;;  %v202_v47 = vshrl.u32 %v23_v12, 7 }
  0xae   :  { %v233_v56 = vsub.s32 2, %v202_v47  ;;  %v294_v59 = vsub.s32 6, %v202_v47 }
  0xec   :  { %v97_v54 = vpop.permute.xlu1 %96  ;;  %v120_v55 = vpop.permute.xlu0 %119 }
  0xf0   :  { %v142_v57 = vpop.permute.xlu1 %141  ;;  %v165_v58 = vpop.permute.xlu0 %164 }
  0xf4   :  { %v122_v60 = vpop.permute.xlu1 %121  ;;  %v95_v61 = vpop.permute.xlu0 %94 }
  0xf5   :  { %v123_v63 = vsel %vm98_vm4, %v120_v55, %v122_v60  ;;  %v99_v0 = vsel %vm98_vm4, %v95_v61, %v97_v54  ;;  %v100_v1 = vsel %vm98_vm4, %v97_v54, %v95_v61  ;;  %v124_v16 = vsel %vm98_vm4, %v122_v60, %v120_v55 }
  0xf6   :  { %v105_v3 = vmul.f32 %v103_v49, %v100_v1  ;;  %v106_v4 = vmul.f32 %v103_v49, %v99_v0  ;;  %v130_v10 = vmul.f32 %v502_v32, %v123_v63  ;;  %v129_v29 = vmul.f32 %v502_v32, %v124_v16 }
  0xf7   :  { %v282_v54 = vsub.s32 5, %v202_v47  ;;  %v203_v55 = vsub.s32 0, %v202_v47  ;;  %v249_v60 = vsub.s32 3, %v202_v47  ;;  %v306_v61 = vsub.s32 7, %v202_v47 }
  0xf8   :  { %v132_v11 = vadd.f32 %v118_v2, %v106_v4  ;;  %v167_v14 = vpop.permute.xlu1 %166  ;;  %v140_v15 = vpop.permute.xlu0 %139  ;;  %v131_v22 = vadd.f32 %v117_v8, %v105_v3 }
  0xf9   :  { %v144_v17 = vsel %vm143_vm5, %v140_v15, %v142_v57  ;;  %v145_v18 = vsel %vm143_vm5, %v142_v57, %v140_v15  ;;  %v169_v24 = vsel %vm143_vm5, %v167_v14, %v165_v58  ;;  %v168_v26 = vsel %vm143_vm5, %v165_v58, %v167_v14 }
  0xfa   :  { %v134_v23 = vadd.f32 %v132_v11, %v130_v10  ;;  %v150_v27 = vmul.f32 %v148_v35, %v144_v17  ;;  %v151_v28 = vmul.f32 %v148_v35, %v145_v18  ;;  %v175_v31 = vmul.f32 %v172_v48, %v169_v24 }
  0xfb   :  { %v133_v36 = vadd.f32 %v131_v22, %v129_v29  ;;  %v174_v37 = vmul.f32 %v172_v48, %v168_v26  ;;  %v342_v35 = vsel %vm46_vm9, 1.0, %v412_v21  ;;  %v272_v21 = vsub.s32 4, %v202_v47 }
  0xfc   :  { %v136_v30 = vmul.f32 %v341_v7, %v134_v23  ;;  %v176_v33 = vadd.f32 %v162_v20, %v150_v27  ;;  %v177_v34 = vadd.f32 %v163_v25, %v151_v28 }
  0xfd   :  { %v135_v42 = vmul.f32 %v340_v13, %v133_v36 }
  0xfe   :  { %v138_v39 = vadd.f32 %v136_v30, %v93_v46  ;;  %v179_v40 = vadd.f32 %v177_v34, %v175_v31  ;;  %v178_v41 = vadd.f32 %v176_v33, %v174_v37  ;;  %v217_v46 = vsub.s32 1, %v202_v47 }
  0xff   :  { %v137_v49 = vadd.f32 %v135_v42, %v511_v45 }
 0x100   :  { %v181_v32 = vmul.f32 %v343_v38, %v179_v40  ;;  %v180_v44 = vmul.f32 %v342_v35, %v178_v41 }
 0x102   :  { %v183_v43 = vadd.f32 %v181_v32, %v138_v39  ;;  %v182_v48 = vadd.f32 %v180_v44, %v137_v49 }
 0x109   :  { %v199_v50 = vpop.permute.xlu1 %198  ;;  %v188_v51 = vpop.permute.xlu0 %187 }
 0x10a   :  { %v190_v52 = vadd.f32 %v188_v51, %v182_v48  ;;  %v191_v53 = vadd.f32 %v188_v51, %v183_v43 }
 0x10c   :  { %v192_v57 = vmax.f32 %v190_v52, 0.0  ;;  %v193_v58 = vmax.f32 %v191_v53, 0.0 }
 0x10e   :  { %v213_v62 = vpop.permute.xlu1 %212  ;;  %v218_v63 = vrot.slane %v192_v57, %v217_v46  ;;  %v222_v12 = vrot.slane %v193_v58, %v217_v46  ;;  %v283_v0 = vrot.slane %v192_v57, %v282_v54  ;;  %v287_v45 = vrot.slane %v193_v58, %v282_v54  ;;  %v229_v5 = vpop.permute.xlu0 %228 }
 0x10f   :  { %v204_v1 = vrot.slane %v192_v57, %v203_v55  ;;  %v208_v2 = vrot.slane %v193_v58, %v203_v55  ;;  %v234_v3 = vrot.slane %v192_v57, %v233_v56  ;;  %v238_v4 = vrot.slane %v193_v58, %v233_v56 }
 0x110   :  { %v223_v6 = vmul.f32 %v218_v63, %v213_v62  ;;  %v224_v7 = vmul.f32 %v222_v12, %v213_v62  ;;  %v288_v8 = vmul.f32 %v283_v0, %v213_v62  ;;  %v289_v9 = vmul.f32 %v287_v45, %v213_v62 }
 0x111   :  { %v209_v10 = vmul.f32 %v204_v1, %v199_v50  ;;  %v210_v11 = vmul.f32 %v208_v2, %v199_v50  ;;  %v273_v14 = vrot.slane %v192_v57, %v272_v21  ;;  %v277_v15 = vrot.slane %v193_v58, %v272_v21 }
 0x112   :  { %v295_v16 = vrot.slane %v192_v57, %v294_v59  ;;  %v299_v17 = vrot.slane %v193_v58, %v294_v59  ;;  %v239_v18 = vmul.f32 %v234_v3, %v229_v5  ;;  %v240_v19 = vmul.f32 %v238_v4, %v229_v5 }
 0x113   :  { %v225_v20 = vadd.f32 %v223_v6, %v209_v10  ;;  %v226_v22 = vadd.f32 %v224_v7, %v210_v11  ;;  %v278_v23 = vmul.f32 %v273_v14, %v199_v50  ;;  %v279_v24 = vmul.f32 %v277_v15, %v199_v50  ;;  %v245_v25 = vpop.permute.xlu1 %244 }
 0x114   :  { %v300_v26 = vmul.f32 %v295_v16, %v229_v5  ;;  %v301_v27 = vmul.f32 %v299_v17, %v229_v5  ;;  %v250_v28 = vrot.slane %v192_v57, %v249_v60  ;;  %v254_v29 = vrot.slane %v193_v58, %v249_v60 }
 0x115   :  { %v290_v30 = vadd.f32 %v288_v8, %v278_v23  ;;  %v291_v31 = vadd.f32 %v289_v9, %v279_v24  ;;  %v241_v33 = vadd.f32 %v239_v18, %v225_v20  ;;  %v242_v34 = vadd.f32 %v240_v19, %v226_v22 }
 0x116   :  { %v255_v36 = vmul.f32 %v250_v28, %v245_v25  ;;  %v256_v37 = vmul.f32 %v254_v29, %v245_v25  ;;  %v307_v38 = vrot.slane %v192_v57, %v306_v61  ;;  %v311_v39 = vrot.slane %v193_v58, %v306_v61 }
 0x117   :  { %v302_v40 = vadd.f32 %v300_v26, %v290_v30  ;;  %v303_v13 = vadd.f32 %v301_v27, %v291_v31 }
 0x118   :  { %v312_v41 = vmul.f32 %v307_v38, %v245_v25  ;;  %v313_v35 = vmul.f32 %v311_v39, %v245_v25  ;;  %v262_v32 = vpop.permute.xlu1 %261  ;;  %v257_v42 = vadd.f32 %v255_v36, %v241_v33  ;;  %v258_v43 = vadd.f32 %v256_v37, %v242_v34 }
 0x11a   :  { %v264_v44 = vadd.f32 %v262_v32, %v257_v42  ;;  %v265_v47 = vadd.f32 %v262_v32, %v258_v43  ;;  %v314_v49 = vadd.f32 %v312_v41, %v302_v40  ;;  %v315_v48 = vadd.f32 %v313_v35, %v303_v13 }
 0x11c   :  { %v266_v50 = vmax.f32 %v264_v44, 0.0  ;;  %v267_v51 = vmax.f32 %v265_v47, 0.0  ;;  %v316_v52 = vadd.f32 %v314_v49, %v262_v32  ;;  %v317_v53 = vadd.f32 %v315_v48, %v262_v32 }
 0x11e   :  { %268 = vst [vmem:[#allocation2] sm:$0xff] %v266_v50  ;;  %269 = vst [vmem:[#allocation2 + $0x8] sm:$0xff] %v267_v51  ;;  %v318_v46 = vmax.f32 %v316_v52, 0.0  ;;  %v319_v54 = vmax.f32 %v317_v53, 0.0 }
 0x120   :  { %320 = vst [vmem:[#allocation2 + $0x10] sm:$0xff] %v318_v46  ;;  %321 = vst [vmem:[#allocation2 + $0x18] sm:$0xff] %v319_v54 }
 0x121   :  { %386 = shalt.err (!%p383_p4)
}
 0x122   :  { %s387_s9 = scalar_lea.hbm %s573_s5, 512 }
 0x123   :  { %p388_p5 = scmp.ne.s32.totalorder %s573_s5, %s387_s9  ;;  %p391_p6 = scmp.lt.u32.totalorder %s387_s9, %s573_s5 }
 0x125   :  { %p393_p7 = pnand %p391_p6, %p388_p5 }
 0x127   :  { %396 = shalt.err (!%p393_p7)
}
 0x128   :  { %s414_s14 = smov 256  }
 0x129   :  { %333 = dma.vmem_to_hbm [thread:$0]  %s328_s4, 512, %s573_s5, [#allocation3], %s414_s14, %s414_s14, %s400_s21  }
 0x12a   :  { %397 = dma.done.wait [#allocation3], 512  }
 0x12b   :  { %398 = vsyncadd [#allocation3], 4294966784 }
 0x12c   :  { %337 = vsyncpa [#allocation3], 1 }

</bundles_post_ra>
